<compile_context>
chip_gen: v6e
topology: v6e:2x2x1
jax: 0.10.0
libtpu: 0.0.40
codegen_flags: <defaults>
</compile_context>

<pallas_src>
import jax
import jax.numpy as jnp
import numpy as np
from jax.experimental import pallas as pl
from jax.experimental.pallas import tpu as pltpu


def _lstm_kernel(x_ref, wih_ref, whh_ref, b_ref, wlin_ref, blin_ref, out_ref):
    """Backward-direction LSTM over the full sequence + Linear(H, 1).

    x_ref   : (B, T, E)   full sequence (batch_first, no transpose needed)
    wih_ref : (E, 4H)     W_ih^T (gate order i, f, g, o — PyTorch convention)
    whh_ref : (H, 4H)     W_hh^T
    b_ref   : (1, 4H)     b_ih + b_hh
    wlin_ref: (1, H)      final linear weight (row layout, for lane reduce)
    blin_ref: (1, 1)      final linear bias
    out_ref : (B, 1)      result
    """
    B, T, E = x_ref.shape
    H = whh_ref.shape[0]
    G = 4 * H

    # --- Pre-pass (off the serial path): input projection for ALL timesteps as
    #     one batched MXU matmul, bias folded in.  Both reshapes are
    #     tile-aligned (second-minor dim is 8 / leading-dim merge), i.e. free.
    x2d = x_ref[...].reshape(B * T, E)                                   # (B*T, E)
    z_in = (jnp.dot(x2d, wih_ref[...], preferred_element_type=jnp.float32)
            + b_ref[...])                                                # (B*T, 4H)
    z_in = z_in.reshape(B, T, G)                                         # (B, T, 4H)

    whh = whh_ref[...]                                                   # (H, 4H)

    h = jnp.zeros((B, H), jnp.float32)
    c = jnp.zeros((B, H), jnp.float32)

    # --- Reverse-time recurrence, fully unrolled (T static & small).
    #     Per step: one small MXU dot + elementwise gates; h/c stay in vregs.
    for t in range(T - 1, -1, -1):
        z = z_in[:, t, :] + jnp.dot(h, whh, preferred_element_type=jnp.float32)
        i_g = jax.nn.sigmoid(z[:, 0 * H:1 * H])
        f_g = jax.nn.sigmoid(z[:, 1 * H:2 * H])
        g_g = jnp.tanh(z[:, 2 * H:3 * H])
        o_g = jax.nn.sigmoid(z[:, 3 * H:4 * H])
        c = f_g * c + i_g * g_g
        h = o_g * jnp.tanh(c)

    # --- Final Linear(H, 1): lane reduce (VPU/XLU) instead of an N=1 MXU matmul.
    out_ref[...] = (jnp.sum(h * wlin_ref[...], axis=-1, keepdims=True)
                    + blin_ref[...])


@jax.jit
def lstm_forward(text, w_ih_rev, w_hh_rev, b_ih_rev, b_hh_rev, w_lin, b_lin):
    """text: (B, T, E) float — returns (B, 1) float32 (matches LSTM.forward)."""
    x = text.astype(jnp.float32)                       # (B, T, E) — no transpose
    B, T, E = x.shape
    H = w_hh_rev.shape[1]

    # Glue: tiny parameter massaging stays in plain JAX (weights are ~16 KiB).
    wih_t = jnp.transpose(w_ih_rev).astype(jnp.float32)       # (E, 4H)
    whh_t = jnp.transpose(w_hh_rev).astype(jnp.float32)       # (H, 4H)
    bias = (b_ih_rev + b_hh_rev).reshape(1, 4 * H).astype(jnp.float32)
    wlin = w_lin.reshape(1, H).astype(jnp.float32)            # (1, H) row
    blin = b_lin.reshape(1, 1).astype(jnp.float32)

    grid_spec = pltpu.PrefetchScalarGridSpec(
        num_scalar_prefetch=0,
        grid=(1,),                 # single invocation: everything resident in VMEM
        in_specs=[
            pl.BlockSpec((B, T, E), lambda s: (0, 0, 0)),
            pl.BlockSpec((E, 4 * H), lambda s: (0, 0)),
            pl.BlockSpec((H, 4 * H), lambda s: (0, 0)),
            pl.BlockSpec((1, 4 * H), lambda s: (0, 0)),
            pl.BlockSpec((1, H), lambda s: (0, 0)),
            pl.BlockSpec((1, 1), lambda s: (0, 0)),
        ],
        out_specs=pl.BlockSpec((B, 1), lambda s: (0, 0)),
    )

    return pl.pallas_call(
        _lstm_kernel,
        out_shape=jax.ShapeDtypeStruct((B, 1), jnp.float32),
        grid_spec=grid_spec,
        compiler_params=pltpu.CompilerParams(
            dimension_semantics=("arbitrary",)),
    )(x, wih_t, whh_t, bias, wlin, blin)


def reference_forward(text, w_ih, w_hh, b_ih, b_hh, w_lin, b_lin):
    """Pure-JAX reference of the same math (backward-direction LSTM + linear)."""
    x = text.astype(jnp.float32)
    B, T, E = x.shape
    H = w_hh.shape[1]
    h = jnp.zeros((B, H), jnp.float32)
    c = jnp.zeros((B, H), jnp.float32)
    for t in range(T - 1, -1, -1):
        z = x[:, t, :] @ w_ih.T + h @ w_hh.T + b_ih + b_hh
        i_g = jax.nn.sigmoid(z[:, :H])
        f_g = jax.nn.sigmoid(z[:, H:2 * H])
        g_g = jnp.tanh(z[:, 2 * H:3 * H])
        o_g = jax.nn.sigmoid(z[:, 3 * H:])
        c = f_g * c + i_g * g_g
        h = o_g * jnp.tanh(c)
    return h @ w_lin.T + b_lin


if __name__ == "__main__":
    # Module hyperparameters: embedding_dim=16, hidden_dim=32, n_layers=1,
    # dropout=0.5 (unused: with n_layers == 1, forward() applies no dropout).
    B, T, E, H = 2, 8, 16, 32

    key = jax.random.PRNGKey(0)
    ks = jax.random.split(key, 8)
    bound = 1.0 / np.sqrt(H)   # PyTorch default uniform(-1/sqrt(H), 1/sqrt(H))
    uni = lambda k, shape: jax.random.uniform(k, shape, jnp.float32, -bound, bound)

    # Only the *reverse*-direction layer-0 parameters affect the output.
    w_ih_rev = uni(ks[0], (4 * H, E))   # weight_ih_l0_reverse
    w_hh_rev = uni(ks[1], (4 * H, H))   # weight_hh_l0_reverse
    b_ih_rev = uni(ks[2], (4 * H,))     # bias_ih_l0_reverse
    b_hh_rev = uni(ks[3], (4 * H,))     # bias_hh_l0_reverse
    w_lin = uni(ks[4], (1, H))          # linear.weight
    b_lin = uni(ks[5], (1,))            # linear.bias

    text = jax.random.normal(ks[6], (B, T, E), jnp.float32)   # (B, T, E) embeddings

    out = lstm_forward(text, w_ih_rev, w_hh_rev, b_ih_rev, b_hh_rev, w_lin, b_lin)
    out = jax.block_until_ready(out)

    ref = reference_forward(text, w_ih_rev, w_hh_rev, b_ih_rev, b_hh_rev,
                            w_lin, b_lin)
    np.testing.assert_allclose(np.asarray(out), np.asarray(ref),
                               rtol=2e-2, atol=2e-3)
    assert out.shape == (B, 1) and out.dtype == jnp.float32

    print("KERNEL_OK")
</pallas_src>

<mosaic_0001>
module attributes {stable_mosaic.version = 11 : i64} {
  func.func @_lstm_kernel(%arg0: i32, %arg1: memref<2x8x16xf32, #tpu.memory_space<vmem>>, %arg2: memref<16x128xf32, #tpu.memory_space<vmem>>, %arg3: memref<32x128xf32, #tpu.memory_space<vmem>>, %arg4: memref<1x128xf32, #tpu.memory_space<vmem>>, %arg5: memref<1x32xf32, #tpu.memory_space<vmem>>, %arg6: memref<1x1xf32, #tpu.memory_space<vmem>>, %arg7: memref<2x1xf32, #tpu.memory_space<vmem>>) attributes {dimension_semantics = [#tpu.dimension_semantics<arbitrary>], iteration_bounds = array<i64: 1>, scalar_prefetch = 0 : i64, scratch_operands = 0 : i64, tpu.core_type = #tpu.core_type<tc>, window_params = [{pipeline_mode = #tpu.pipeline_mode<synchronous>, transform_indices = @transform_0, window_bounds = array<i64: 2, 8, 16>}, {pipeline_mode = #tpu.pipeline_mode<synchronous>, transform_indices = @transform_1, window_bounds = array<i64: 16, 128>}, {pipeline_mode = #tpu.pipeline_mode<synchronous>, transform_indices = @transform_2, window_bounds = array<i64: 32, 128>}, {pipeline_mode = #tpu.pipeline_mode<synchronous>, transform_indices = @transform_3, window_bounds = array<i64: 1, 128>}, {pipeline_mode = #tpu.pipeline_mode<synchronous>, transform_indices = @transform_4, window_bounds = array<i64: 1, 32>}, {pipeline_mode = #tpu.pipeline_mode<synchronous>, transform_indices = @transform_5, window_bounds = array<i64: 1, 1>}, {pipeline_mode = #tpu.pipeline_mode<synchronous>, transform_indices = @transform_6, window_bounds = array<i64: 2, 1>}]} {
    %c0 = arith.constant 0 : index
    %c0_0 = arith.constant 0 : index
    %c0_1 = arith.constant 0 : index
    %0 = vector.load %arg1[%c0, %c0_0, %c0_1] : memref<2x8x16xf32, #tpu.memory_space<vmem>>, vector<2x8x16xf32>
    %1 = vector.shape_cast %0 : vector<2x8x16xf32> to vector<16x16xf32>
    %c0_2 = arith.constant 0 : index
    %c0_3 = arith.constant 0 : index
    %2 = vector.load %arg2[%c0_2, %c0_3] : memref<16x128xf32, #tpu.memory_space<vmem>>, vector<16x128xf32>
    %cst = arith.constant dense<0.000000e+00> : vector<16x128xf32>
    %3 = tpu.matmul %1, %2, %cst {dimension_numbers = #tpu.dot_dimension_numbers<[1], [0], [0], [1], [0, 0, 1, 1], [], []>} : vector<16x16xf32>, vector<16x128xf32>, vector<16x128xf32> -> vector<16x128xf32>
    %c0_4 = arith.constant 0 : index
    %c0_5 = arith.constant 0 : index
    %4 = vector.load %arg4[%c0_4, %c0_5] : memref<1x128xf32, #tpu.memory_space<vmem>>, vector<1x128xf32>
    %5 = vector.broadcast %4 : vector<1x128xf32> to vector<16x128xf32>
    %6 = arith.addf %3, %5 : vector<16x128xf32>
    %7 = vector.shape_cast %6 : vector<16x128xf32> to vector<2x8x128xf32>
    %c0_6 = arith.constant 0 : index
    %c0_7 = arith.constant 0 : index
    %8 = vector.load %arg3[%c0_6, %c0_7] : memref<32x128xf32, #tpu.memory_space<vmem>>, vector<32x128xf32>
    %cst_8 = arith.constant 0.000000e+00 : f32
    %9 = vector.broadcast %cst_8 : f32 to vector<2x32xf32>
    %cst_9 = arith.constant 0.000000e+00 : f32
    %10 = vector.broadcast %cst_9 : f32 to vector<2x32xf32>
    %11 = vector.extract_strided_slice %7 {offsets = [0, 7, 0], sizes = [2, 1, 128], strides = [1, 1, 1]} : vector<2x8x128xf32> to vector<2x1x128xf32>
    %12 = vector.shape_cast %11 : vector<2x1x128xf32> to vector<2x128xf32>
    %cst_10 = arith.constant dense<0.000000e+00> : vector<2x128xf32>
    %13 = tpu.matmul %9, %8, %cst_10 {dimension_numbers = #tpu.dot_dimension_numbers<[1], [0], [0], [1], [0, 0, 1, 1], [], []>} : vector<2x32xf32>, vector<32x128xf32>, vector<2x128xf32> -> vector<2x128xf32>
    %14 = arith.addf %12, %13 : vector<2x128xf32>
    %15 = vector.extract_strided_slice %14 {offsets = [0, 0], sizes = [2, 32], strides = [1, 1]} : vector<2x128xf32> to vector<2x32xf32>
    %16 = arith.negf %15 : vector<2x32xf32>
    %17 = math.exp %16 : vector<2x32xf32>
    %cst_11 = arith.constant 1.000000e+00 : f32
    %18 = vector.broadcast %cst_11 : f32 to vector<2x32xf32>
    %19 = arith.addf %18, %17 : vector<2x32xf32>
    %20 = arith.divf %18, %19 : vector<2x32xf32>
    %21 = vector.extract_strided_slice %14 {offsets = [0, 32], sizes = [2, 32], strides = [1, 1]} : vector<2x128xf32> to vector<2x32xf32>
    %22 = arith.negf %21 : vector<2x32xf32>
    %23 = math.exp %22 : vector<2x32xf32>
    %cst_12 = arith.constant 1.000000e+00 : f32
    %24 = vector.broadcast %cst_12 : f32 to vector<2x32xf32>
    %25 = arith.addf %24, %23 : vector<2x32xf32>
    %26 = arith.divf %24, %25 : vector<2x32xf32>
    %27 = vector.extract_strided_slice %14 {offsets = [0, 64], sizes = [2, 32], strides = [1, 1]} : vector<2x128xf32> to vector<2x32xf32>
    %28 = math.tanh %27 : vector<2x32xf32>
    %29 = vector.extract_strided_slice %14 {offsets = [0, 96], sizes = [2, 32], strides = [1, 1]} : vector<2x128xf32> to vector<2x32xf32>
    %30 = arith.negf %29 : vector<2x32xf32>
    %31 = math.exp %30 : vector<2x32xf32>
    %cst_13 = arith.constant 1.000000e+00 : f32
    %32 = vector.broadcast %cst_13 : f32 to vector<2x32xf32>
    %33 = arith.addf %32, %31 : vector<2x32xf32>
    %34 = arith.divf %32, %33 : vector<2x32xf32>
    %35 = arith.mulf %26, %10 : vector<2x32xf32>
    %36 = arith.mulf %20, %28 : vector<2x32xf32>
    %37 = arith.addf %35, %36 : vector<2x32xf32>
    %38 = math.tanh %37 : vector<2x32xf32>
    %39 = arith.mulf %34, %38 : vector<2x32xf32>
    %40 = vector.extract_strided_slice %7 {offsets = [0, 6, 0], sizes = [2, 1, 128], strides = [1, 1, 1]} : vector<2x8x128xf32> to vector<2x1x128xf32>
    %41 = vector.shape_cast %40 : vector<2x1x128xf32> to vector<2x128xf32>
    %cst_14 = arith.constant dense<0.000000e+00> : vector<2x128xf32>
    %42 = tpu.matmul %39, %8, %cst_14 {dimension_numbers = #tpu.dot_dimension_numbers<[1], [0], [0], [1], [0, 0, 1, 1], [], []>} : vector<2x32xf32>, vector<32x128xf32>, vector<2x128xf32> -> vector<2x128xf32>
    %43 = arith.addf %41, %42 : vector<2x128xf32>
    %44 = vector.extract_strided_slice %43 {offsets = [0, 0], sizes = [2, 32], strides = [1, 1]} : vector<2x128xf32> to vector<2x32xf32>
    %45 = arith.negf %44 : vector<2x32xf32>
    %46 = math.exp %45 : vector<2x32xf32>
    %cst_15 = arith.constant 1.000000e+00 : f32
    %47 = vector.broadcast %cst_15 : f32 to vector<2x32xf32>
    %48 = arith.addf %47, %46 : vector<2x32xf32>
    %49 = arith.divf %47, %48 : vector<2x32xf32>
    %50 = vector.extract_strided_slice %43 {offsets = [0, 32], sizes = [2, 32], strides = [1, 1]} : vector<2x128xf32> to vector<2x32xf32>
    %51 = arith.negf %50 : vector<2x32xf32>
    %52 = math.exp %51 : vector<2x32xf32>
    %cst_16 = arith.constant 1.000000e+00 : f32
    %53 = vector.broadcast %cst_16 : f32 to vector<2x32xf32>
    %54 = arith.addf %53, %52 : vector<2x32xf32>
    %55 = arith.divf %53, %54 : vector<2x32xf32>
    %56 = vector.extract_strided_slice %43 {offsets = [0, 64], sizes = [2, 32], strides = [1, 1]} : vector<2x128xf32> to vector<2x32xf32>
    %57 = math.tanh %56 : vector<2x32xf32>
    %58 = vector.extract_strided_slice %43 {offsets = [0, 96], sizes = [2, 32], strides = [1, 1]} : vector<2x128xf32> to vector<2x32xf32>
    %59 = arith.negf %58 : vector<2x32xf32>
    %60 = math.exp %59 : vector<2x32xf32>
    %cst_17 = arith.constant 1.000000e+00 : f32
    %61 = vector.broadcast %cst_17 : f32 to vector<2x32xf32>
    %62 = arith.addf %61, %60 : vector<2x32xf32>
    %63 = arith.divf %61, %62 : vector<2x32xf32>
    %64 = arith.mulf %55, %37 : vector<2x32xf32>
    %65 = arith.mulf %49, %57 : vector<2x32xf32>
    %66 = arith.addf %64, %65 : vector<2x32xf32>
    %67 = math.tanh %66 : vector<2x32xf32>
    %68 = arith.mulf %63, %67 : vector<2x32xf32>
    %69 = vector.extract_strided_slice %7 {offsets = [0, 5, 0], sizes = [2, 1, 128], strides = [1, 1, 1]} : vector<2x8x128xf32> to vector<2x1x128xf32>
    %70 = vector.shape_cast %69 : vector<2x1x128xf32> to vector<2x128xf32>
    %cst_18 = arith.constant dense<0.000000e+00> : vector<2x128xf32>
    %71 = tpu.matmul %68, %8, %cst_18 {dimension_numbers = #tpu.dot_dimension_numbers<[1], [0], [0], [1], [0, 0, 1, 1], [], []>} : vector<2x32xf32>, vector<32x128xf32>, vector<2x128xf32> -> vector<2x128xf32>
    %72 = arith.addf %70, %71 : vector<2x128xf32>
    %73 = vector.extract_strided_slice %72 {offsets = [0, 0], sizes = [2, 32], strides = [1, 1]} : vector<2x128xf32> to vector<2x32xf32>
    %74 = arith.negf %73 : vector<2x32xf32>
    %75 = math.exp %74 : vector<2x32xf32>
    %cst_19 = arith.constant 1.000000e+00 : f32
    %76 = vector.broadcast %cst_19 : f32 to vector<2x32xf32>
    %77 = arith.addf %76, %75 : vector<2x32xf32>
    %78 = arith.divf %76, %77 : vector<2x32xf32>
    %79 = vector.extract_strided_slice %72 {offsets = [0, 32], sizes = [2, 32], strides = [1, 1]} : vector<2x128xf32> to vector<2x32xf32>
    %80 = arith.negf %79 : vector<2x32xf32>
    %81 = math.exp %80 : vector<2x32xf32>
    %cst_20 = arith.constant 1.000000e+00 : f32
    %82 = vector.broadcast %cst_20 : f32 to vector<2x32xf32>
    %83 = arith.addf %82, %81 : vector<2x32xf32>
    %84 = arith.divf %82, %83 : vector<2x32xf32>
    %85 = vector.extract_strided_slice %72 {offsets = [0, 64], sizes = [2, 32], strides = [1, 1]} : vector<2x128xf32> to vector<2x32xf32>
    %86 = math.tanh %85 : vector<2x32xf32>
    %87 = vector.extract_strided_slice %72 {offsets = [0, 96], sizes = [2, 32], strides = [1, 1]} : vector<2x128xf32> to vector<2x32xf32>
    %88 = arith.negf %87 : vector<2x32xf32>
    %89 = math.exp %88 : vector<2x32xf32>
    %cst_21 = arith.constant 1.000000e+00 : f32
    %90 = vector.broadcast %cst_21 : f32 to vector<2x32xf32>
    %91 = arith.addf %90, %89 : vector<2x32xf32>
    %92 = arith.divf %90, %91 : vector<2x32xf32>
    %93 = arith.mulf %84, %66 : vector<2x32xf32>
    %94 = arith.mulf %78, %86 : vector<2x32xf32>
    %95 = arith.addf %93, %94 : vector<2x32xf32>
    %96 = math.tanh %95 : vector<2x32xf32>
    %97 = arith.mulf %92, %96 : vector<2x32xf32>
    %98 = vector.extract_strided_slice %7 {offsets = [0, 4, 0], sizes = [2, 1, 128], strides = [1, 1, 1]} : vector<2x8x128xf32> to vector<2x1x128xf32>
    %99 = vector.shape_cast %98 : vector<2x1x128xf32> to vector<2x128xf32>
    %cst_22 = arith.constant dense<0.000000e+00> : vector<2x128xf32>
    %100 = tpu.matmul %97, %8, %cst_22 {dimension_numbers = #tpu.dot_dimension_numbers<[1], [0], [0], [1], [0, 0, 1, 1], [], []>} : vector<2x32xf32>, vector<32x128xf32>, vector<2x128xf32> -> vector<2x128xf32>
    %101 = arith.addf %99, %100 : vector<2x128xf32>
    %102 = vector.extract_strided_slice %101 {offsets = [0, 0], sizes = [2, 32], strides = [1, 1]} : vector<2x128xf32> to vector<2x32xf32>
    %103 = arith.negf %102 : vector<2x32xf32>
    %104 = math.exp %103 : vector<2x32xf32>
    %cst_23 = arith.constant 1.000000e+00 : f32
    %105 = vector.broadcast %cst_23 : f32 to vector<2x32xf32>
    %106 = arith.addf %105, %104 : vector<2x32xf32>
    %107 = arith.divf %105, %106 : vector<2x32xf32>
    %108 = vector.extract_strided_slice %101 {offsets = [0, 32], sizes = [2, 32], strides = [1, 1]} : vector<2x128xf32> to vector<2x32xf32>
    %109 = arith.negf %108 : vector<2x32xf32>
    %110 = math.exp %109 : vector<2x32xf32>
    %cst_24 = arith.constant 1.000000e+00 : f32
    %111 = vector.broadcast %cst_24 : f32 to vector<2x32xf32>
    %112 = arith.addf %111, %110 : vector<2x32xf32>
    %113 = arith.divf %111, %112 : vector<2x32xf32>
    %114 = vector.extract_strided_slice %101 {offsets = [0, 64], sizes = [2, 32], strides = [1, 1]} : vector<2x128xf32> to vector<2x32xf32>
    %115 = math.tanh %114 : vector<2x32xf32>
    %116 = vector.extract_strided_slice %101 {offsets = [0, 96], sizes = [2, 32], strides = [1, 1]} : vector<2x128xf32> to vector<2x32xf32>
    %117 = arith.negf %116 : vector<2x32xf32>
    %118 = math.exp %117 : vector<2x32xf32>
    %cst_25 = arith.constant 1.000000e+00 : f32
    %119 = vector.broadcast %cst_25 : f32 to vector<2x32xf32>
    %120 = arith.addf %119, %118 : vector<2x32xf32>
    %121 = arith.divf %119, %120 : vector<2x32xf32>
    %122 = arith.mulf %113, %95 : vector<2x32xf32>
    %123 = arith.mulf %107, %115 : vector<2x32xf32>
    %124 = arith.addf %122, %123 : vector<2x32xf32>
    %125 = math.tanh %124 : vector<2x32xf32>
    %126 = arith.mulf %121, %125 : vector<2x32xf32>
    %127 = vector.extract_strided_slice %7 {offsets = [0, 3, 0], sizes = [2, 1, 128], strides = [1, 1, 1]} : vector<2x8x128xf32> to vector<2x1x128xf32>
    %128 = vector.shape_cast %127 : vector<2x1x128xf32> to vector<2x128xf32>
    %cst_26 = arith.constant dense<0.000000e+00> : vector<2x128xf32>
    %129 = tpu.matmul %126, %8, %cst_26 {dimension_numbers = #tpu.dot_dimension_numbers<[1], [0], [0], [1], [0, 0, 1, 1], [], []>} : vector<2x32xf32>, vector<32x128xf32>, vector<2x128xf32> -> vector<2x128xf32>
    %130 = arith.addf %128, %129 : vector<2x128xf32>
    %131 = vector.extract_strided_slice %130 {offsets = [0, 0], sizes = [2, 32], strides = [1, 1]} : vector<2x128xf32> to vector<2x32xf32>
    %132 = arith.negf %131 : vector<2x32xf32>
    %133 = math.exp %132 : vector<2x32xf32>
    %cst_27 = arith.constant 1.000000e+00 : f32
    %134 = vector.broadcast %cst_27 : f32 to vector<2x32xf32>
    %135 = arith.addf %134, %133 : vector<2x32xf32>
    %136 = arith.divf %134, %135 : vector<2x32xf32>
    %137 = vector.extract_strided_slice %130 {offsets = [0, 32], sizes = [2, 32], strides = [1, 1]} : vector<2x128xf32> to vector<2x32xf32>
    %138 = arith.negf %137 : vector<2x32xf32>
    %139 = math.exp %138 : vector<2x32xf32>
    %cst_28 = arith.constant 1.000000e+00 : f32
    %140 = vector.broadcast %cst_28 : f32 to vector<2x32xf32>
    %141 = arith.addf %140, %139 : vector<2x32xf32>
    %142 = arith.divf %140, %141 : vector<2x32xf32>
    %143 = vector.extract_strided_slice %130 {offsets = [0, 64], sizes = [2, 32], strides = [1, 1]} : vector<2x128xf32> to vector<2x32xf32>
    %144 = math.tanh %143 : vector<2x32xf32>
    %145 = vector.extract_strided_slice %130 {offsets = [0, 96], sizes = [2, 32], strides = [1, 1]} : vector<2x128xf32> to vector<2x32xf32>
    %146 = arith.negf %145 : vector<2x32xf32>
    %147 = math.exp %146 : vector<2x32xf32>
    %cst_29 = arith.constant 1.000000e+00 : f32
    %148 = vector.broadcast %cst_29 : f32 to vector<2x32xf32>
    %149 = arith.addf %148, %147 : vector<2x32xf32>
    %150 = arith.divf %148, %149 : vector<2x32xf32>
    %151 = arith.mulf %142, %124 : vector<2x32xf32>
    %152 = arith.mulf %136, %144 : vector<2x32xf32>
    %153 = arith.addf %151, %152 : vector<2x32xf32>
    %154 = math.tanh %153 : vector<2x32xf32>
    %155 = arith.mulf %150, %154 : vector<2x32xf32>
    %156 = vector.extract_strided_slice %7 {offsets = [0, 2, 0], sizes = [2, 1, 128], strides = [1, 1, 1]} : vector<2x8x128xf32> to vector<2x1x128xf32>
    %157 = vector.shape_cast %156 : vector<2x1x128xf32> to vector<2x128xf32>
    %cst_30 = arith.constant dense<0.000000e+00> : vector<2x128xf32>
    %158 = tpu.matmul %155, %8, %cst_30 {dimension_numbers = #tpu.dot_dimension_numbers<[1], [0], [0], [1], [0, 0, 1, 1], [], []>} : vector<2x32xf32>, vector<32x128xf32>, vector<2x128xf32> -> vector<2x128xf32>
    %159 = arith.addf %157, %158 : vector<2x128xf32>
    %160 = vector.extract_strided_slice %159 {offsets = [0, 0], sizes = [2, 32], strides = [1, 1]} : vector<2x128xf32> to vector<2x32xf32>
    %161 = arith.negf %160 : vector<2x32xf32>
    %162 = math.exp %161 : vector<2x32xf32>
    %cst_31 = arith.constant 1.000000e+00 : f32
    %163 = vector.broadcast %cst_31 : f32 to vector<2x32xf32>
    %164 = arith.addf %163, %162 : vector<2x32xf32>
    %165 = arith.divf %163, %164 : vector<2x32xf32>
    %166 = vector.extract_strided_slice %159 {offsets = [0, 32], sizes = [2, 32], strides = [1, 1]} : vector<2x128xf32> to vector<2x32xf32>
    %167 = arith.negf %166 : vector<2x32xf32>
    %168 = math.exp %167 : vector<2x32xf32>
    %cst_32 = arith.constant 1.000000e+00 : f32
    %169 = vector.broadcast %cst_32 : f32 to vector<2x32xf32>
    %170 = arith.addf %169, %168 : vector<2x32xf32>
    %171 = arith.divf %169, %170 : vector<2x32xf32>
    %172 = vector.extract_strided_slice %159 {offsets = [0, 64], sizes = [2, 32], strides = [1, 1]} : vector<2x128xf32> to vector<2x32xf32>
    %173 = math.tanh %172 : vector<2x32xf32>
    %174 = vector.extract_strided_slice %159 {offsets = [0, 96], sizes = [2, 32], strides = [1, 1]} : vector<2x128xf32> to vector<2x32xf32>
    %175 = arith.negf %174 : vector<2x32xf32>
    %176 = math.exp %175 : vector<2x32xf32>
    %cst_33 = arith.constant 1.000000e+00 : f32
    %177 = vector.broadcast %cst_33 : f32 to vector<2x32xf32>
    %178 = arith.addf %177, %176 : vector<2x32xf32>
    %179 = arith.divf %177, %178 : vector<2x32xf32>
    %180 = arith.mulf %171, %153 : vector<2x32xf32>
    %181 = arith.mulf %165, %173 : vector<2x32xf32>
    %182 = arith.addf %180, %181 : vector<2x32xf32>
    %183 = math.tanh %182 : vector<2x32xf32>
    %184 = arith.mulf %179, %183 : vector<2x32xf32>
    %185 = vector.extract_strided_slice %7 {offsets = [0, 1, 0], sizes = [2, 1, 128], strides = [1, 1, 1]} : vector<2x8x128xf32> to vector<2x1x128xf32>
    %186 = vector.shape_cast %185 : vector<2x1x128xf32> to vector<2x128xf32>
    %cst_34 = arith.constant dense<0.000000e+00> : vector<2x128xf32>
    %187 = tpu.matmul %184, %8, %cst_34 {dimension_numbers = #tpu.dot_dimension_numbers<[1], [0], [0], [1], [0, 0, 1, 1], [], []>} : vector<2x32xf32>, vector<32x128xf32>, vector<2x128xf32> -> vector<2x128xf32>
    %188 = arith.addf %186, %187 : vector<2x128xf32>
    %189 = vector.extract_strided_slice %188 {offsets = [0, 0], sizes = [2, 32], strides = [1, 1]} : vector<2x128xf32> to vector<2x32xf32>
    %190 = arith.negf %189 : vector<2x32xf32>
    %191 = math.exp %190 : vector<2x32xf32>
    %cst_35 = arith.constant 1.000000e+00 : f32
    %192 = vector.broadcast %cst_35 : f32 to vector<2x32xf32>
    %193 = arith.addf %192, %191 : vector<2x32xf32>
    %194 = arith.divf %192, %193 : vector<2x32xf32>
    %195 = vector.extract_strided_slice %188 {offsets = [0, 32], sizes = [2, 32], strides = [1, 1]} : vector<2x128xf32> to vector<2x32xf32>
    %196 = arith.negf %195 : vector<2x32xf32>
    %197 = math.exp %196 : vector<2x32xf32>
    %cst_36 = arith.constant 1.000000e+00 : f32
    %198 = vector.broadcast %cst_36 : f32 to vector<2x32xf32>
    %199 = arith.addf %198, %197 : vector<2x32xf32>
    %200 = arith.divf %198, %199 : vector<2x32xf32>
    %201 = vector.extract_strided_slice %188 {offsets = [0, 64], sizes = [2, 32], strides = [1, 1]} : vector<2x128xf32> to vector<2x32xf32>
    %202 = math.tanh %201 : vector<2x32xf32>
    %203 = vector.extract_strided_slice %188 {offsets = [0, 96], sizes = [2, 32], strides = [1, 1]} : vector<2x128xf32> to vector<2x32xf32>
    %204 = arith.negf %203 : vector<2x32xf32>
    %205 = math.exp %204 : vector<2x32xf32>
    %cst_37 = arith.constant 1.000000e+00 : f32
    %206 = vector.broadcast %cst_37 : f32 to vector<2x32xf32>
    %207 = arith.addf %206, %205 : vector<2x32xf32>
    %208 = arith.divf %206, %207 : vector<2x32xf32>
    %209 = arith.mulf %200, %182 : vector<2x32xf32>
    %210 = arith.mulf %194, %202 : vector<2x32xf32>
    %211 = arith.addf %209, %210 : vector<2x32xf32>
    %212 = math.tanh %211 : vector<2x32xf32>
    %213 = arith.mulf %208, %212 : vector<2x32xf32>
    %214 = vector.extract_strided_slice %7 {offsets = [0, 0, 0], sizes = [2, 1, 128], strides = [1, 1, 1]} : vector<2x8x128xf32> to vector<2x1x128xf32>
    %215 = vector.shape_cast %214 : vector<2x1x128xf32> to vector<2x128xf32>
    %cst_38 = arith.constant dense<0.000000e+00> : vector<2x128xf32>
    %216 = tpu.matmul %213, %8, %cst_38 {dimension_numbers = #tpu.dot_dimension_numbers<[1], [0], [0], [1], [0, 0, 1, 1], [], []>} : vector<2x32xf32>, vector<32x128xf32>, vector<2x128xf32> -> vector<2x128xf32>
    %217 = arith.addf %215, %216 : vector<2x128xf32>
    %218 = vector.extract_strided_slice %217 {offsets = [0, 0], sizes = [2, 32], strides = [1, 1]} : vector<2x128xf32> to vector<2x32xf32>
    %219 = arith.negf %218 : vector<2x32xf32>
    %220 = math.exp %219 : vector<2x32xf32>
    %cst_39 = arith.constant 1.000000e+00 : f32
    %221 = vector.broadcast %cst_39 : f32 to vector<2x32xf32>
    %222 = arith.addf %221, %220 : vector<2x32xf32>
    %223 = arith.divf %221, %222 : vector<2x32xf32>
    %224 = vector.extract_strided_slice %217 {offsets = [0, 32], sizes = [2, 32], strides = [1, 1]} : vector<2x128xf32> to vector<2x32xf32>
    %225 = arith.negf %224 : vector<2x32xf32>
    %226 = math.exp %225 : vector<2x32xf32>
    %cst_40 = arith.constant 1.000000e+00 : f32
    %227 = vector.broadcast %cst_40 : f32 to vector<2x32xf32>
    %228 = arith.addf %227, %226 : vector<2x32xf32>
    %229 = arith.divf %227, %228 : vector<2x32xf32>
    %230 = vector.extract_strided_slice %217 {offsets = [0, 64], sizes = [2, 32], strides = [1, 1]} : vector<2x128xf32> to vector<2x32xf32>
    %231 = math.tanh %230 : vector<2x32xf32>
    %232 = vector.extract_strided_slice %217 {offsets = [0, 96], sizes = [2, 32], strides = [1, 1]} : vector<2x128xf32> to vector<2x32xf32>
    %233 = arith.negf %232 : vector<2x32xf32>
    %234 = math.exp %233 : vector<2x32xf32>
    %cst_41 = arith.constant 1.000000e+00 : f32
    %235 = vector.broadcast %cst_41 : f32 to vector<2x32xf32>
    %236 = arith.addf %235, %234 : vector<2x32xf32>
    %237 = arith.divf %235, %236 : vector<2x32xf32>
    %238 = arith.mulf %229, %211 : vector<2x32xf32>
    %239 = arith.mulf %223, %231 : vector<2x32xf32>
    %240 = arith.addf %238, %239 : vector<2x32xf32>
    %241 = math.tanh %240 : vector<2x32xf32>
    %242 = arith.mulf %237, %241 : vector<2x32xf32>
    %c0_42 = arith.constant 0 : index
    %c0_43 = arith.constant 0 : index
    %243 = vector.load %arg5[%c0_42, %c0_43] : memref<1x32xf32, #tpu.memory_space<vmem>>, vector<1x32xf32>
    %244 = vector.broadcast %243 : vector<1x32xf32> to vector<2x32xf32>
    %245 = arith.mulf %242, %244 : vector<2x32xf32>
    %cst_44 = arith.constant dense<0.000000e+00> : vector<2xf32>
    %246 = vector.multi_reduction <add>, %245, %cst_44 [1] : vector<2x32xf32> to vector<2xf32>
    %247 = vector.shape_cast %246 : vector<2xf32> to vector<2x1xf32>
    %c0_45 = arith.constant 0 : index
    %c0_46 = arith.constant 0 : index
    %248 = vector.load %arg6[%c0_45, %c0_46] : memref<1x1xf32, #tpu.memory_space<vmem>>, vector<1x1xf32>
    %249 = vector.broadcast %248 : vector<1x1xf32> to vector<2x1xf32>
    %250 = arith.addf %247, %249 : vector<2x1xf32>
    %c0_47 = arith.constant 0 : index
    %c0_48 = arith.constant 0 : index
    %251 = vector.load %arg7[%c0_47, %c0_48] : memref<2x1xf32, #tpu.memory_space<vmem>>, vector<2x1xf32>
    tpu.vector_store %arg7[%c0_47, %c0_48], %250 {strides = array<i32>} : memref<2x1xf32, #tpu.memory_space<vmem>>, vector<2x1xf32>,
    return
  }
  func.func @transform_0(%arg0: i32) -> (i32, i32, i32) {
    %c0_i32 = arith.constant 0 : i32
    %c0_i32_0 = arith.constant 0 : i32
    %c0_i32_1 = arith.constant 0 : i32
    %c0_i32_2 = arith.constant 0 : i32
    return %c0_i32, %c0_i32_0, %c0_i32_1 : i32, i32, i32
  }
  func.func @transform_1(%arg0: i32) -> (i32, i32) {
    %c0_i32 = arith.constant 0 : i32
    %c0_i32_0 = arith.constant 0 : i32
    %c0_i32_1 = arith.constant 0 : i32
    return %c0_i32, %c0_i32_0 : i32, i32
  }
  func.func @transform_2(%arg0: i32) -> (i32, i32) {
    %c0_i32 = arith.constant 0 : i32
    %c0_i32_0 = arith.constant 0 : i32
    %c0_i32_1 = arith.constant 0 : i32
    return %c0_i32, %c0_i32_0 : i32, i32
  }
  func.func @transform_3(%arg0: i32) -> (i32, i32) {
    %c0_i32 = arith.constant 0 : i32
    %c0_i32_0 = arith.constant 0 : i32
    %c0_i32_1 = arith.constant 0 : i32
    return %c0_i32, %c0_i32_0 : i32, i32
  }
  func.func @transform_4(%arg0: i32) -> (i32, i32) {
    %c0_i32 = arith.constant 0 : i32
    %c0_i32_0 = arith.constant 0 : i32
    %c0_i32_1 = arith.constant 0 : i32
    return %c0_i32, %c0_i32_0 : i32, i32
  }
  func.func @transform_5(%arg0: i32) -> (i32, i32) {
    %c0_i32 = arith.constant 0 : i32
    %c0_i32_0 = arith.constant 0 : i32
    %c0_i32_1 = arith.constant 0 : i32
    return %c0_i32, %c0_i32_0 : i32, i32
  }
  func.func @transform_6(%arg0: i32) -> (i32, i32) {
    %c0_i32 = arith.constant 0 : i32
    %c0_i32_0 = arith.constant 0 : i32
    %c0_i32_1 = arith.constant 0 : i32
    return %c0_i32, %c0_i32_0 : i32, i32
  }
}

</mosaic_0001>

<bundles_post_ra>
// kernel: lstm_forward.1
= control target key start
LH: loop header
LB: loop body
LE: loop exit
PB: predicated region body
PF: predicated region fallthrough
CT: control target
= control target key end

     0   :  { %s1927_s0 = inlined_call_operand.hbm [shape: f32[2,8,16], index: 0, kind: input, shape index: {}]   ;;  %s1928_s1 = inlined_call_operand.hbm [shape: f32[16,128], index: 1, kind: input, shape index: {}]   ;;  %s1929_s2 = inlined_call_operand.hbm [shape: f32[32,128], index: 2, kind: input, shape index: {}]   ;;  %s1930_s3 = inlined_call_operand.vmem [shape: f32[1,128], index: 3, kind: input, shape index: {}]   ;;  %s1931_s4 = inlined_call_operand.vmem [shape: f32[1,32], index: 4, kind: input, shape index: {}]   ;;  %s1932_s5 = inlined_call_operand.<no memory space> [shape: f32[1,1], index: 5, kind: input, shape index: {}]   ;;  %s1933_s6 = inlined_call_operand.vmem [shape: f32[2,1], index: 6, kind: output, shape index: {}]  }
   0x1   :  { %v11_v0 = vstv %s1932_s5 }
   0x2   :  { %12 = vst [vmem:[#allocation2] sm:$0x1] %v11_v0 }
   0x3   :  { %13 = vsyncpa [#allocation4], 0 }
   0x4   :  { %14 = vsyncpa [#allocation6], 0  ;;  %s1677_s23 = smov [#allocation5]   ;;  %s1678_s25 = smov [#allocation3]  }
   0x5   :  { %s32_s24 = sshll.u32 %s1677_s23, 4  ;;  %s20_s26 = sshll.u32 %s1678_s25, 4  ;;  %s33_s24 = int_to_ptr.vmem [resolvable:$true] %s32_s24  ;;  %s21_s26 = int_to_ptr.vmem [resolvable:$true] %s20_s26 }
   0x6   :  { %s1621_s27 = scalar_lea.vmem %s33_s24, 256  ;;  %p1626_p1 = scmp.lt.s32.totalorder %s33_s24, %s33_s24 }
   0x7   :  { %p1622_p0 = scmp.ne.s32.totalorder %s33_s24, %s1621_s27  ;;  %p1627_p2 = scmp.lt.s32.totalorder %s1621_s27, %s1621_s27 }
   0x9   :  { %p1628_p3 = por %p1627_p2, %p1626_p1 }
   0xb   :  { %p1629_p4 = pnand %p1628_p3, %p1622_p0 }
   0xd   :  { %1632 = shalt.err (!%p1629_p4)
}
   0xe   :  { %s1679_s28 = smov 128   ;;  %s1680_s29 = smov 8  }
   0xf   :  { %38 = dma.hbm_to_vmem [thread:$0]  %s1928_s1, 256, %s33_s24, [#allocation6], %s1679_s28, %s1679_s28, %s1680_s29  }
  0x10   :  { %s1641_s7 = scalar_lea.vmem %s21_s26, 256  ;;  %p1646_p6 = scmp.lt.s32.totalorder %s21_s26, %s21_s26 }
  0x11   :  { %p1642_p5 = scmp.ne.s32.totalorder %s21_s26, %s1641_s7  ;;  %p1647_p7 = scmp.lt.s32.totalorder %s1641_s7, %s1641_s7 }
  0x13   :  { %p1648_p8 = por %p1647_p7, %p1646_p6 }
  0x15   :  { %p1649_p9 = pnand %p1648_p8, %p1642_p5 }
  0x17   :  { %1652 = shalt.err (!%p1649_p9)
}
  0x18   :  { %26 = dma.hbm_to_vmem [thread:$0]  %s1927_s0, 256, %s21_s26, [#allocation4], %s1679_s28, %s1679_s28, %s1680_s29  }
  0x19   :  { %s1681_s10 = smov [#allocation7]  }
  0x1a   :  { %s44_s11 = sshll.u32 %s1681_s10, 4  ;;  %s45_s11 = int_to_ptr.vmem [resolvable:$true] %s44_s11 }
  0x1b   :  { %s1661_s12 = scalar_lea.vmem %s45_s11, 512  ;;  %p1666_p11 = scmp.lt.s32.totalorder %s45_s11, %s45_s11 }
  0x1c   :  { %p1662_p10 = scmp.ne.s32.totalorder %s45_s11, %s1661_s12  ;;  %p1667_p12 = scmp.lt.s32.totalorder %s1661_s12, %s1661_s12 }
  0x1e   :  { %p1668_p13 = por %p1667_p12, %p1666_p11 }
  0x20   :  { %p1669_p0 = pnand %p1668_p13, %p1662_p10 }
  0x22   :  { %1672 = shalt.err (!%p1669_p0)
}
  0x23   :  { %50 = dma.hbm_to_vmem [thread:$0]  %s1929_s2, 512, %s45_s11, [#allocation6], %s1679_s28, %s1679_s28, %s1680_s29  }
  0x24   :  { %1673 = dma.done.wait [#allocation4], 256  }
  0x25   :  { %1674 = vsyncadd [#allocation4], 4294967040 }
  0x26   :  { %1675 = dma.done.wait [#allocation6], 768  }
  0x27   :  { %1676 = vsyncadd [#allocation6], 4294966528  ;;  %v1682_v1 = vmov 0.0   ;;  %vm1683_vm0 = vmmov 0   ;;  %v69_v2 = vld [vmem:[#allocation5 + $0x8] sm:$0xff]  ;;  %v68_v4 = vld [vmem:[#allocation5] sm:$0xff] }
  0x28   :  { %1387 = vmatprep.subr.mxu1 %v1682_v1  ;;  %1395 = vmatprep.mubr.msk.f32.mxu1 %vm1683_vm0, %v1682_v1  ;;  %v1737_v3 = vld [vmem:[#allocation7 + $0x18] sm:$0xff]  ;;  %v1740_v5 = vld [vmem:[#allocation7 + $0x10] sm:$0xff]  ;;  %v66_v6 = vld [vmem:[#allocation3] sm:$0xff]  ;;  %vm77_vm1 = vcmask 130048   ;;  %s1684_s14 = smov 64   ;;  %vm296_vm2 = vcmask 1041409  }
  0x29   :  { %1380 = vmatprep.subr.mxu0 %v69_v2  ;;  %1388 = vmatpush3.msra.mxu1 %v1737_v3  ;;  %v67_v7 = vld [vmem:[#allocation3 + $0x8] sm:$0xff]  ;;  %v1747_v9 = vld [vmem:[#allocation7] sm:$0xff]  ;;  %v1308_v11 = vld [vmem:[%s1930_s3] ss:$0 sm:$0xff]  ;;  %s1685_s3 = smov 32   ;;  %vm163_vm3 = vcmask 261120  }
  0x2a   :  { %1381 = vmatpush3.msra.mxu0 %v69_v2  ;;  %1389 = vmatprep.subr.mxu1 %v1682_v1  ;;  %v1744_v8 = vld [vmem:[#allocation7 + $0x8] sm:$0xff]  ;;  %s1686_s17 = smov 96   ;;  %vm1288_vm4 = vcmask 254976   ;;  %vm1300_vm5 = vcmask 1024  }
  0x2b   :  { %1382 = vmatprep.subr.mxu0 %v68_v4  ;;  %1390 = vmatpush3.msra.mxu1 %v1740_v5 }
  0x2c   :  { %1383 = vmatpush3.msra.mxu0 %v68_v4  ;;  %1384 = vmatprep.mubr.msk.f32.mxu0 %vm77_vm1, %v66_v6 }
  0x2d   :  { %1391 = vmatprep.subr.mxu1 %v1682_v1  ;;  %1385 = vmatmul.mubr.msk.f32.vlgmr.msra.gmra.mxu0 %vm77_vm1, %v67_v7 }
  0x2e   :  { %1392 = vmatpush3.msra.mxu1 %v1744_v8  ;;  %1398 = vmatprep.subr.mxu0 %v1682_v1 }
  0x2f   :  { %1393 = vmatprep.subr.mxu1 %v1682_v1  ;;  %1399 = vmatpush3.msra.mxu0 %v1737_v3 }
  0x30   :  { %1394 = vmatpush3.msra.mxu1 %v1747_v9  ;;  %1400 = vmatprep.subr.mxu0 %v1682_v1 }
  0x31   :  { %1396 = vmatmul.mubr.f32.vlgmr.msra.gmra.mxu1 %v1682_v1  ;;  %1401 = vmatpush3.msra.mxu0 %v1740_v5 }
  0x32   :  { %1402 = vmatprep.subr.mxu0 %v1682_v1  ;;  %1406 = vmatprep.mubr.msk.f32.mxu0 %vm1683_vm0, %v1682_v1 }
  0x33   :  { %1403 = vmatpush3.msra.mxu0 %v1744_v8  ;;  %1409 = vmatprep.subr.mxu1 %v1682_v1 }
  0x34   :  { %1404 = vmatprep.subr.mxu0 %v1682_v1  ;;  %1410 = vmatpush3.msra.mxu1 %v1737_v3 }
  0x35   :  { %1405 = vmatpush3.msra.mxu0 %v1747_v9  ;;  %1411 = vmatprep.subr.mxu1 %v1682_v1 }
  0x36   :  { %1412 = vmatpush3.msra.mxu1 %v1740_v5  ;;  %1417 = vmatprep.mubr.msk.f32.mxu1 %vm1683_vm0, %v1682_v1 }
  0x37   :  { %1413 = vmatprep.subr.mxu1 %v1682_v1  ;;  %1420 = vmatprep.subr.mxu0 %v1682_v1 }
  0x38   :  { %1414 = vmatpush3.msra.mxu1 %v1744_v8 }
  0x39   :  { %1415 = vmatprep.subr.mxu1 %v1682_v1 }
  0x3a   :  { %1416 = vmatpush3.msra.mxu1 %v1747_v9 }
  0x3b   :  { %1431 = vmatprep.subr.mxu1 %v1682_v1 }
  0xed   :  { %v1386_v10 = vpop.f32.mrf.mxu0 }
  0xee   :  { %v1780_v18 = vadd.f32 %v1386_v10, %v1308_v11 }
  0xef   :  { %v150_v12 = vpop.f32.mrf.mxu0 }
  0xf0   :  { %v1778_v13 = vadd.f32 %v1308_v11, %v150_v12 }
  0xf1   :  { %v233_v14 = vpop.f32.mrf.mxu1 }
  0xf2   :  { %v238_v15 = vrot.slane %v233_v14, 1  ;;  %v239_v16 = vrot.slane %v233_v14, 2 }
  0xf3   :  { %v1397_v17 = vpop.f32.mrf.mxu1 }
  0xf4   :  { %v242_v19 = vadd.f32 %v238_v15, %v1778_v13  ;;  %v243_v20 = vadd.f32 %v239_v16, %v1780_v18 }
  0xf6   :  { %1485 = vtanh.f32 %v242_v19  ;;  %v1311_v23 = vmul.f32 -1.442695, %v242_v19  ;;  %v1312_v24 = vmul.f32 -1.442695, %v243_v20 }
  0xf7   :  { %1487 = vtanh.f32 %v243_v20 }
  0xf8   :  { %1489 = vpow2.f32 %v1311_v23 }
  0xf9   :  { %1491 = vpow2.f32 %v1312_v24 }
 0x103   :  { %v1486_v21 = vpop.eup %1485 }
 0x104   :  { %262 = vrot.lane.b32.xlu0 %v1486_v21, %s1684_s14  ;;  %v1488_v22 = vpop.eup %1487 }
 0x105   :  { %v1490_v25 = vpop.eup %1489 }
 0x106   :  { %v250_v26 = vadd.f32 1.0, %v1490_v25  ;;  %v1492_v27 = vpop.eup %1491 }
 0x107   :  { %v251_v28 = vadd.f32 1.0, %v1492_v27 }
 0x108   :  { %264 = vrot.lane.b32.xlu0 %v1488_v22, %s1684_s14  ;;  %1493 = vrcp.f32 %v250_v26 }
 0x109   :  { %1495 = vrcp.f32 %v251_v28 }
 0x115   :  { %v1494_v29 = vpop.eup %1493 }
 0x116   :  { %v1496_v32 = vpop.eup %1495  ;;  %v258_v35 = vmul.f32 0.0, %v1494_v29 }
 0x117   :  { %v259_v38 = vmul.f32 0.0, %v1496_v32 }
 0x176   :  { %v263_v30 = vpop.permute.xlu0 %262 }
 0x177   :  { %v268_v31 = vmul.f32 %v1494_v29, %v263_v30 }
 0x179   :  { %272 = vrot.lane.b32.xlu1 %v268_v31, %s1685_s3 }
 0x17a   :  { %v265_v33 = vpop.permute.xlu0 %264 }
 0x17b   :  { %v269_v34 = vmul.f32 %v1496_v32, %v265_v33 }
 0x17d   :  { %274 = vrot.lane.b32.xlu1 %v269_v34, %s1685_s3 }
 0x1eb   :  { %v273_v36 = vpop.permute.xlu1 %272 }
 0x1ec   :  { %v1788_v37 = vadd.f32 %v273_v36, %v258_v35 }
 0x1ee   :  { %1497 = vtanh.f32 %v1788_v37  ;;  %v395_v12 = vrot.slane %v1788_v37, 1 }
 0x1ef   :  { %v275_v39 = vpop.permute.xlu1 %274 }
 0x1f0   :  { %v279_v40 = vadd.f32 %v275_v39, %v259_v38 }
 0x1f2   :  { %1499 = vtanh.f32 %v279_v40  ;;  %v396_v14 = vrot.slane %v279_v40, 1 }
 0x1fb   :  { %v1498_v41 = vpop.eup %1497 }
 0x1fc   :  { %284 = vrot.lane.b32.xlu0 %v1498_v41, %s1684_s14 }
 0x1ff   :  { %v1500_v42 = vpop.eup %1499 }
 0x200   :  { %286 = vrot.lane.b32.xlu1 %v1500_v42, %s1684_s14 }
 0x26e   :  { %v285_v43 = vpop.permute.xlu0 %284 }
 0x26f   :  { %v290_v44 = vmul.f32 %v1494_v29, %v285_v43 }
 0x271   :  { %v294_v47 = vrot.slane %v290_v44, 7 }
 0x272   :  { %v287_v45 = vpop.permute.xlu1 %286 }
 0x273   :  { %v291_v46 = vmul.f32 %v1496_v32, %v287_v45 }
 0x275   :  { %v295_v48 = vrot.slane %v291_v46, 6 }
 0x277   :  { %v297_v49 = vsel %vm296_vm2, %v295_v48, %v294_v47 }
 0x278   :  { %298 = vrot.lane.b32.xlu0 %v297_v49, %s1685_s3 }
 0x2ea   :  { %v299_v50 = vpop.permute.xlu0 %298 }
 0x2eb   :  { %1407 = vmatmul.mubr.msk.f32.vlgmr.msra.gmra.mxu0 %vm163_vm3, %v299_v50 }
 0x2ec   :  { %1421 = vmatpush3.msra.mxu0 %v1737_v3  ;;  %1428 = vmatprep.mubr.msk.f32.mxu0 %vm1683_vm0, %v1682_v1 }
 0x2ed   :  { %1422 = vmatprep.subr.mxu0 %v1682_v1 }
 0x2ee   :  { %1423 = vmatpush3.msra.mxu0 %v1740_v5 }
 0x2ef   :  { %1424 = vmatprep.subr.mxu0 %v1682_v1 }
 0x2f0   :  { %1425 = vmatpush3.msra.mxu0 %v1744_v8 }
 0x2f1   :  { %1426 = vmatprep.subr.mxu0 %v1682_v1 }
 0x2f2   :  { %1427 = vmatpush3.msra.mxu0 %v1747_v9 }
 0x2f3   :  { %1442 = vmatprep.subr.mxu0 %v1682_v1 }
 0x3ab   :  { %v368_v51 = vpop.f32.mrf.mxu0 }
 0x3ac   :  { %v373_v52 = vrot.slane %v368_v51, 2  ;;  %v374_v53 = vrot.slane %v368_v51, 3 }
 0x3ad   :  { %v1408_v54 = vpop.f32.mrf.mxu0 }
 0x3ae   :  { %v377_v55 = vadd.f32 %v373_v52, %v1778_v13  ;;  %v378_v56 = vadd.f32 %v374_v53, %v1780_v18 }
 0x3b0   :  { %1501 = vtanh.f32 %v377_v55  ;;  %v1314_v59 = vmul.f32 -1.442695, %v377_v55  ;;  %v1315_v60 = vmul.f32 -1.442695, %v378_v56 }
 0x3b1   :  { %1503 = vtanh.f32 %v378_v56 }
 0x3b2   :  { %1505 = vpow2.f32 %v1314_v59 }
 0x3b3   :  { %1507 = vpow2.f32 %v1315_v60 }
 0x3bd   :  { %v1502_v57 = vpop.eup %1501 }
 0x3be   :  { %v1504_v58 = vpop.eup %1503  ;;  %403 = vrot.lane.b32.xlu1 %v1502_v57, %s1684_s14 }
 0x3bf   :  { %405 = vrot.lane.b32.xlu0 %v1504_v58, %s1684_s14  ;;  %v1506_v61 = vpop.eup %1505 }
 0x3c0   :  { %v1508_v62 = vpop.eup %1507  ;;  %v385_v63 = vadd.f32 1.0, %v1506_v61 }
 0x3c1   :  { %v386_v0 = vadd.f32 1.0, %v1508_v62 }
 0x3c2   :  { %1509 = vrcp.f32 %v385_v63 }
 0x3c3   :  { %1511 = vrcp.f32 %v386_v0 }
 0x3cf   :  { %v1510_v2 = vpop.eup %1509 }
 0x3d0   :  { %v1512_v6 = vpop.eup %1511  ;;  %v399_v15 = vmul.f32 %v1510_v2, %v395_v12 }
 0x3d1   :  { %v400_v16 = vmul.f32 %v1512_v6, %v396_v14 }
 0x430   :  { %v404_v4 = vpop.permute.xlu1 %403 }
 0x431   :  { %v406_v7 = vpop.permute.xlu0 %405  ;;  %v409_v10 = vmul.f32 %v1510_v2, %v404_v4 }
 0x432   :  { %v410_v11 = vmul.f32 %v1512_v6, %v406_v7 }
 0x433   :  { %413 = vrot.lane.b32.xlu1 %v409_v10, %s1685_s3 }
 0x434   :  { %415 = vrot.lane.b32.xlu0 %v410_v11, %s1685_s3 }
 0x4a5   :  { %v414_v17 = vpop.permute.xlu1 %413 }
 0x4a6   :  { %v416_v19 = vpop.permute.xlu0 %415  ;;  %v419_v20 = vadd.f32 %v414_v17, %v399_v15 }
 0x4a7   :  { %v420_v21 = vadd.f32 %v416_v19, %v400_v16 }
 0x4a8   :  { %1513 = vtanh.f32 %v419_v20  ;;  %v535_v52 = vrot.slane %v419_v20, 1 }
 0x4a9   :  { %1515 = vtanh.f32 %v420_v21  ;;  %v536_v53 = vrot.slane %v420_v21, 1 }
 0x4b5   :  { %v1514_v22 = vpop.eup %1513 }
 0x4b6   :  { %v1516_v23 = vpop.eup %1515  ;;  %425 = vrot.lane.b32.xlu1 %v1514_v22, %s1684_s14 }
 0x4b7   :  { %427 = vrot.lane.b32.xlu0 %v1516_v23, %s1684_s14 }
 0x528   :  { %v426_v24 = vpop.permute.xlu1 %425 }
 0x529   :  { %v428_v25 = vpop.permute.xlu0 %427  ;;  %v431_v26 = vmul.f32 %v1510_v2, %v426_v24 }
 0x52a   :  { %v432_v27 = vmul.f32 %v1512_v6, %v428_v25 }
 0x52b   :  { %v435_v28 = vrot.slane %v431_v26, 6 }
 0x52c   :  { %v436_v29 = vrot.slane %v432_v27, 5 }
 0x52e   :  { %v437_v30 = vsel %vm296_vm2, %v436_v29, %v435_v28 }
 0x52f   :  { %438 = vrot.lane.b32.xlu1 %v437_v30, %s1685_s3 }
 0x5a1   :  { %v439_v31 = vpop.permute.xlu1 %438 }
 0x5a2   :  { %1418 = vmatmul.mubr.msk.f32.vlgmr.msra.gmra.mxu1 %vm163_vm3, %v439_v31 }
 0x5a3   :  { %1432 = vmatpush3.msra.mxu1 %v1737_v3  ;;  %1439 = vmatprep.mubr.msk.f32.mxu1 %vm1683_vm0, %v1682_v1 }
 0x5a4   :  { %1433 = vmatprep.subr.mxu1 %v1682_v1 }
 0x5a5   :  { %1434 = vmatpush3.msra.mxu1 %v1740_v5 }
 0x5a6   :  { %1435 = vmatprep.subr.mxu1 %v1682_v1 }
 0x5a7   :  { %1436 = vmatpush3.msra.mxu1 %v1744_v8 }
 0x5a8   :  { %1437 = vmatprep.subr.mxu1 %v1682_v1 }
 0x5a9   :  { %1438 = vmatpush3.msra.mxu1 %v1747_v9 }
 0x5aa   :  { %1453 = vmatprep.subr.mxu1 %v1682_v1 }
 0x662   :  { %v508_v32 = vpop.f32.mrf.mxu1 }
 0x663   :  { %v513_v33 = vrot.slane %v508_v32, 3  ;;  %v514_v34 = vrot.slane %v508_v32, 4 }
 0x664   :  { %v1419_v35 = vpop.f32.mrf.mxu1 }
 0x665   :  { %v517_v36 = vadd.f32 %v513_v33, %v1778_v13  ;;  %v518_v37 = vadd.f32 %v514_v34, %v1780_v18 }
 0x667   :  { %1517 = vtanh.f32 %v517_v36  ;;  %v1317_v40 = vmul.f32 -1.442695, %v517_v36  ;;  %v1318_v41 = vmul.f32 -1.442695, %v518_v37 }
 0x668   :  { %1519 = vtanh.f32 %v518_v37 }
 0x669   :  { %1521 = vpow2.f32 %v1317_v40 }
 0x66a   :  { %1523 = vpow2.f32 %v1318_v41 }
 0x674   :  { %v1518_v38 = vpop.eup %1517 }
 0x675   :  { %v1520_v39 = vpop.eup %1519  ;;  %543 = vrot.lane.b32.xlu0 %v1518_v38, %s1684_s14 }
 0x676   :  { %545 = vrot.lane.b32.xlu1 %v1520_v39, %s1684_s14  ;;  %v1522_v42 = vpop.eup %1521 }
 0x677   :  { %v1524_v43 = vpop.eup %1523  ;;  %v525_v44 = vadd.f32 1.0, %v1522_v42 }
 0x678   :  { %v526_v45 = vadd.f32 1.0, %v1524_v43 }
 0x679   :  { %1525 = vrcp.f32 %v525_v44 }
 0x67a   :  { %1527 = vrcp.f32 %v526_v45 }
 0x686   :  { %v1526_v46 = vpop.eup %1525 }
 0x687   :  { %v1528_v48 = vpop.eup %1527  ;;  %v539_v54 = vmul.f32 %v1526_v46, %v535_v52 }
 0x688   :  { %v540_v55 = vmul.f32 %v1528_v48, %v536_v53 }
 0x6e7   :  { %v544_v47 = vpop.permute.xlu0 %543 }
 0x6e8   :  { %v546_v49 = vpop.permute.xlu1 %545  ;;  %v549_v50 = vmul.f32 %v1526_v46, %v544_v47 }
 0x6e9   :  { %v550_v51 = vmul.f32 %v1528_v48, %v546_v49 }
 0x6ea   :  { %553 = vrot.lane.b32.xlu0 %v549_v50, %s1685_s3 }
 0x6eb   :  { %555 = vrot.lane.b32.xlu1 %v550_v51, %s1685_s3 }
 0x75c   :  { %v554_v56 = vpop.permute.xlu0 %553 }
 0x75d   :  { %v556_v57 = vpop.permute.xlu1 %555  ;;  %v559_v58 = vadd.f32 %v554_v56, %v539_v54 }
 0x75e   :  { %v560_v59 = vadd.f32 %v556_v57, %v540_v55 }
 0x75f   :  { %1529 = vtanh.f32 %v559_v58  ;;  %v675_v33 = vrot.slane %v559_v58, 1 }
 0x760   :  { %1531 = vtanh.f32 %v560_v59  ;;  %v676_v34 = vrot.slane %v560_v59, 1 }
 0x76c   :  { %v1530_v60 = vpop.eup %1529 }
 0x76d   :  { %v1532_v61 = vpop.eup %1531  ;;  %565 = vrot.lane.b32.xlu0 %v1530_v60, %s1684_s14 }
 0x76e   :  { %567 = vrot.lane.b32.xlu1 %v1532_v61, %s1684_s14 }
 0x7df   :  { %v566_v62 = vpop.permute.xlu0 %565 }
 0x7e0   :  { %v568_v63 = vpop.permute.xlu1 %567  ;;  %v571_v0 = vmul.f32 %v1526_v46, %v566_v62 }
 0x7e1   :  { %v572_v2 = vmul.f32 %v1528_v48, %v568_v63 }
 0x7e2   :  { %v575_v4 = vrot.slane %v571_v0, 5 }
 0x7e3   :  { %v576_v6 = vrot.slane %v572_v2, 4 }
 0x7e5   :  { %v577_v7 = vsel %vm296_vm2, %v576_v6, %v575_v4 }
 0x7e6   :  { %578 = vrot.lane.b32.xlu0 %v577_v7, %s1685_s3 }
 0x858   :  { %v579_v10 = vpop.permute.xlu0 %578 }
 0x859   :  { %1429 = vmatmul.mubr.msk.f32.vlgmr.msra.gmra.mxu0 %vm163_vm3, %v579_v10 }
 0x85a   :  { %1443 = vmatpush3.msra.mxu0 %v1737_v3  ;;  %1450 = vmatprep.mubr.msk.f32.mxu0 %vm1683_vm0, %v1682_v1 }
 0x85b   :  { %1444 = vmatprep.subr.mxu0 %v1682_v1 }
 0x85c   :  { %1445 = vmatpush3.msra.mxu0 %v1740_v5 }
 0x85d   :  { %1446 = vmatprep.subr.mxu0 %v1682_v1 }
 0x85e   :  { %1447 = vmatpush3.msra.mxu0 %v1744_v8 }
 0x85f   :  { %1448 = vmatprep.subr.mxu0 %v1682_v1 }
 0x860   :  { %1449 = vmatpush3.msra.mxu0 %v1747_v9 }
 0x861   :  { %1464 = vmatprep.subr.mxu0 %v1682_v1 }
 0x919   :  { %v648_v11 = vpop.f32.mrf.mxu0 }
 0x91a   :  { %v653_v12 = vrot.slane %v648_v11, 4  ;;  %v654_v14 = vrot.slane %v648_v11, 5 }
 0x91b   :  { %v1430_v15 = vpop.f32.mrf.mxu0 }
 0x91c   :  { %v657_v16 = vadd.f32 %v653_v12, %v1778_v13  ;;  %v658_v17 = vadd.f32 %v654_v14, %v1780_v18 }
 0x91e   :  { %1533 = vtanh.f32 %v657_v16  ;;  %v1320_v21 = vmul.f32 -1.442695, %v657_v16  ;;  %v1321_v22 = vmul.f32 -1.442695, %v658_v17 }
 0x91f   :  { %1535 = vtanh.f32 %v658_v17 }
 0x920   :  { %1537 = vpow2.f32 %v1320_v21 }
 0x921   :  { %1539 = vpow2.f32 %v1321_v22 }
 0x92b   :  { %v1534_v19 = vpop.eup %1533 }
 0x92c   :  { %v1536_v20 = vpop.eup %1535  ;;  %683 = vrot.lane.b32.xlu1 %v1534_v19, %s1684_s14 }
 0x92d   :  { %685 = vrot.lane.b32.xlu0 %v1536_v20, %s1684_s14  ;;  %v1538_v23 = vpop.eup %1537 }
 0x92e   :  { %v1540_v24 = vpop.eup %1539  ;;  %v665_v25 = vadd.f32 1.0, %v1538_v23 }
 0x92f   :  { %v666_v26 = vadd.f32 1.0, %v1540_v24 }
 0x930   :  { %1541 = vrcp.f32 %v665_v25 }
 0x931   :  { %1543 = vrcp.f32 %v666_v26 }
 0x93d   :  { %v1542_v27 = vpop.eup %1541 }
 0x93e   :  { %v1544_v29 = vpop.eup %1543  ;;  %v679_v35 = vmul.f32 %v1542_v27, %v675_v33 }
 0x93f   :  { %v680_v36 = vmul.f32 %v1544_v29, %v676_v34 }
 0x99e   :  { %v684_v28 = vpop.permute.xlu1 %683 }
 0x99f   :  { %v686_v30 = vpop.permute.xlu0 %685  ;;  %v689_v31 = vmul.f32 %v1542_v27, %v684_v28 }
 0x9a0   :  { %v690_v32 = vmul.f32 %v1544_v29, %v686_v30 }
 0x9a1   :  { %693 = vrot.lane.b32.xlu1 %v689_v31, %s1685_s3 }
 0x9a2   :  { %695 = vrot.lane.b32.xlu0 %v690_v32, %s1685_s3 }
 0xa13   :  { %v694_v37 = vpop.permute.xlu1 %693 }
 0xa14   :  { %v696_v38 = vpop.permute.xlu0 %695  ;;  %v699_v39 = vadd.f32 %v694_v37, %v679_v35 }
 0xa15   :  { %v700_v40 = vadd.f32 %v696_v38, %v680_v36 }
 0xa16   :  { %1545 = vtanh.f32 %v699_v39  ;;  %v815_v12 = vrot.slane %v699_v39, 1 }
 0xa17   :  { %1547 = vtanh.f32 %v700_v40  ;;  %v816_v14 = vrot.slane %v700_v40, 1 }
 0xa23   :  { %v1546_v41 = vpop.eup %1545 }
 0xa24   :  { %v1548_v42 = vpop.eup %1547  ;;  %705 = vrot.lane.b32.xlu1 %v1546_v41, %s1684_s14 }
 0xa25   :  { %707 = vrot.lane.b32.xlu0 %v1548_v42, %s1684_s14 }
 0xa96   :  { %v706_v43 = vpop.permute.xlu1 %705 }
 0xa97   :  { %v708_v44 = vpop.permute.xlu0 %707  ;;  %v711_v45 = vmul.f32 %v1542_v27, %v706_v43 }
 0xa98   :  { %v712_v46 = vmul.f32 %v1544_v29, %v708_v44 }
 0xa99   :  { %v715_v47 = vrot.slane %v711_v45, 4 }
 0xa9a   :  { %v716_v48 = vrot.slane %v712_v46, 3 }
 0xa9c   :  { %v717_v49 = vsel %vm296_vm2, %v716_v48, %v715_v47 }
 0xa9d   :  { %718 = vrot.lane.b32.xlu1 %v717_v49, %s1685_s3 }
 0xb0f   :  { %v719_v50 = vpop.permute.xlu1 %718 }
 0xb10   :  { %1440 = vmatmul.mubr.msk.f32.vlgmr.msra.gmra.mxu1 %vm163_vm3, %v719_v50 }
 0xb11   :  { %1454 = vmatpush3.msra.mxu1 %v1737_v3  ;;  %1461 = vmatprep.mubr.msk.f32.mxu1 %vm1683_vm0, %v1682_v1 }
 0xb12   :  { %1455 = vmatprep.subr.mxu1 %v1682_v1 }
 0xb13   :  { %1456 = vmatpush3.msra.mxu1 %v1740_v5 }
 0xb14   :  { %1457 = vmatprep.subr.mxu1 %v1682_v1 }
 0xb15   :  { %1458 = vmatpush3.msra.mxu1 %v1744_v8 }
 0xb16   :  { %1459 = vmatprep.subr.mxu1 %v1682_v1 }
 0xb17   :  { %1460 = vmatpush3.msra.mxu1 %v1747_v9 }
 0xbd0   :  { %v788_v51 = vpop.f32.mrf.mxu1 }
 0xbd1   :  { %v793_v52 = vrot.slane %v788_v51, 5  ;;  %v794_v53 = vrot.slane %v788_v51, 6 }
 0xbd2   :  { %v1441_v54 = vpop.f32.mrf.mxu1 }
 0xbd3   :  { %v797_v55 = vadd.f32 %v793_v52, %v1778_v13  ;;  %v798_v56 = vadd.f32 %v794_v53, %v1780_v18 }
 0xbd5   :  { %1549 = vtanh.f32 %v797_v55  ;;  %v1323_v59 = vmul.f32 -1.442695, %v797_v55  ;;  %v1324_v60 = vmul.f32 -1.442695, %v798_v56 }
 0xbd6   :  { %1551 = vtanh.f32 %v798_v56 }
 0xbd7   :  { %1553 = vpow2.f32 %v1323_v59 }
 0xbd8   :  { %1555 = vpow2.f32 %v1324_v60 }
 0xbe2   :  { %v1550_v57 = vpop.eup %1549 }
 0xbe3   :  { %v1552_v58 = vpop.eup %1551  ;;  %823 = vrot.lane.b32.xlu0 %v1550_v57, %s1684_s14 }
 0xbe4   :  { %825 = vrot.lane.b32.xlu1 %v1552_v58, %s1684_s14  ;;  %v1554_v61 = vpop.eup %1553 }
 0xbe5   :  { %v1556_v62 = vpop.eup %1555  ;;  %v805_v63 = vadd.f32 1.0, %v1554_v61 }
 0xbe6   :  { %v806_v0 = vadd.f32 1.0, %v1556_v62 }
 0xbe7   :  { %1557 = vrcp.f32 %v805_v63 }
 0xbe8   :  { %1559 = vrcp.f32 %v806_v0 }
 0xbf4   :  { %v1558_v2 = vpop.eup %1557 }
 0xbf5   :  { %v1560_v6 = vpop.eup %1559  ;;  %v819_v15 = vmul.f32 %v1558_v2, %v815_v12 }
 0xbf6   :  { %v820_v16 = vmul.f32 %v1560_v6, %v816_v14 }
 0xc55   :  { %v824_v4 = vpop.permute.xlu0 %823 }
 0xc56   :  { %v826_v7 = vpop.permute.xlu1 %825  ;;  %v829_v10 = vmul.f32 %v1558_v2, %v824_v4 }
 0xc57   :  { %v830_v11 = vmul.f32 %v1560_v6, %v826_v7 }
 0xc58   :  { %833 = vrot.lane.b32.xlu0 %v829_v10, %s1685_s3 }
 0xc59   :  { %835 = vrot.lane.b32.xlu1 %v830_v11, %s1685_s3 }
 0xcca   :  { %v834_v17 = vpop.permute.xlu0 %833 }
 0xccb   :  { %v836_v19 = vpop.permute.xlu1 %835  ;;  %v839_v20 = vadd.f32 %v834_v17, %v819_v15 }
 0xccc   :  { %v840_v21 = vadd.f32 %v836_v19, %v820_v16 }
 0xccd   :  { %1561 = vtanh.f32 %v839_v20  ;;  %v955_v47 = vrot.slane %v839_v20, 1 }
 0xcce   :  { %1563 = vtanh.f32 %v840_v21  ;;  %v956_v48 = vrot.slane %v840_v21, 1 }
 0xcda   :  { %v1562_v22 = vpop.eup %1561 }
 0xcdb   :  { %v1564_v23 = vpop.eup %1563  ;;  %845 = vrot.lane.b32.xlu0 %v1562_v22, %s1684_s14 }
 0xcdc   :  { %847 = vrot.lane.b32.xlu1 %v1564_v23, %s1684_s14 }
 0xd4d   :  { %v846_v24 = vpop.permute.xlu0 %845 }
 0xd4e   :  { %v848_v25 = vpop.permute.xlu1 %847  ;;  %v851_v26 = vmul.f32 %v1558_v2, %v846_v24 }
 0xd4f   :  { %v852_v27 = vmul.f32 %v1560_v6, %v848_v25 }
 0xd50   :  { %v855_v28 = vrot.slane %v851_v26, 3 }
 0xd51   :  { %v856_v29 = vrot.slane %v852_v27, 2 }
 0xd53   :  { %v857_v30 = vsel %vm296_vm2, %v856_v29, %v855_v28 }
 0xd54   :  { %858 = vrot.lane.b32.xlu0 %v857_v30, %s1685_s3 }
 0xdc6   :  { %v859_v31 = vpop.permute.xlu0 %858 }
 0xdc7   :  { %1451 = vmatmul.mubr.msk.f32.vlgmr.msra.gmra.mxu0 %vm163_vm3, %v859_v31 }
 0xdc8   :  { %1465 = vmatpush3.msra.mxu0 %v1737_v3  ;;  %1472 = vmatprep.mubr.msk.f32.mxu0 %vm1683_vm0, %v1682_v1 }
 0xdc9   :  { %1466 = vmatprep.subr.mxu0 %v1682_v1 }
 0xdca   :  { %1467 = vmatpush3.msra.mxu0 %v1740_v5 }
 0xdcb   :  { %1468 = vmatprep.subr.mxu0 %v1682_v1 }
 0xdcc   :  { %1469 = vmatpush3.msra.mxu0 %v1744_v8 }
 0xdcd   :  { %1470 = vmatprep.subr.mxu0 %v1682_v1 }
 0xdce   :  { %1471 = vmatpush3.msra.mxu0 %v1747_v9 }
 0xe87   :  { %v928_v32 = vpop.f32.mrf.mxu0 }
 0xe88   :  { %v933_v33 = vrot.slane %v928_v32, 6  ;;  %v934_v34 = vrot.slane %v928_v32, 7 }
 0xe89   :  { %v1452_v35 = vpop.f32.mrf.mxu0 }
 0xe8a   :  { %v937_v3 = vadd.f32 %v933_v33, %v1778_v13  ;;  %v938_v36 = vadd.f32 %v934_v34, %v1780_v18 }
 0xe8c   :  { %1565 = vtanh.f32 %v937_v3  ;;  %v1326_v8 = vmul.f32 -1.442695, %v937_v3  ;;  %v1327_v1 = vmul.f32 -1.442695, %v938_v36 }
 0xe8d   :  { %1567 = vtanh.f32 %v938_v36 }
 0xe8e   :  { %1569 = vpow2.f32 %v1326_v8 }
 0xe8f   :  { %1571 = vpow2.f32 %v1327_v1 }
 0xe99   :  { %v1566_v37 = vpop.eup %1565 }
 0xe9a   :  { %v1568_v5 = vpop.eup %1567  ;;  %963 = vrot.lane.b32.xlu1 %v1566_v37, %s1684_s14 }
 0xe9b   :  { %965 = vrot.lane.b32.xlu0 %v1568_v5, %s1684_s14  ;;  %v1570_v9 = vpop.eup %1569 }
 0xe9c   :  { %v1572_v38 = vpop.eup %1571  ;;  %v945_v39 = vadd.f32 1.0, %v1570_v9 }
 0xe9d   :  { %v946_v40 = vadd.f32 1.0, %v1572_v38 }
 0xe9e   :  { %1573 = vrcp.f32 %v945_v39 }
 0xe9f   :  { %1575 = vrcp.f32 %v946_v40 }
 0xeab   :  { %v1574_v41 = vpop.eup %1573 }
 0xeac   :  { %v1576_v43 = vpop.eup %1575  ;;  %v959_v49 = vmul.f32 %v1574_v41, %v955_v47 }
 0xead   :  { %v960_v50 = vmul.f32 %v1576_v43, %v956_v48 }
 0xf0c   :  { %v964_v42 = vpop.permute.xlu1 %963 }
 0xf0d   :  { %v966_v44 = vpop.permute.xlu0 %965  ;;  %v969_v45 = vmul.f32 %v1574_v41, %v964_v42 }
 0xf0e   :  { %v970_v46 = vmul.f32 %v1576_v43, %v966_v44 }
 0xf0f   :  { %973 = vrot.lane.b32.xlu1 %v969_v45, %s1685_s3 }
 0xf10   :  { %975 = vrot.lane.b32.xlu0 %v970_v46, %s1685_s3 }
 0xf81   :  { %v974_v51 = vpop.permute.xlu1 %973 }
 0xf82   :  { %v976_v52 = vpop.permute.xlu0 %975  ;;  %v979_v53 = vadd.f32 %v974_v51, %v959_v49 }
 0xf83   :  { %v980_v54 = vadd.f32 %v976_v52, %v960_v50 }
 0xf84   :  { %1577 = vtanh.f32 %v979_v53  ;;  %v1094_v29 = vrot.slane %v979_v53, 1 }
 0xf85   :  { %1579 = vtanh.f32 %v980_v54  ;;  %v1095_v27 = vrot.slane %v980_v54, 1 }
 0xf91   :  { %v1578_v55 = vpop.eup %1577 }
 0xf92   :  { %v1580_v56 = vpop.eup %1579  ;;  %985 = vrot.lane.b32.xlu1 %v1578_v55, %s1684_s14 }
 0xf93   :  { %987 = vrot.lane.b32.xlu0 %v1580_v56, %s1684_s14 }
0x1004   :  { %v986_v57 = vpop.permute.xlu1 %985 }
0x1005   :  { %v988_v58 = vpop.permute.xlu0 %987  ;;  %v991_v59 = vmul.f32 %v1574_v41, %v986_v57 }
0x1006   :  { %v992_v60 = vmul.f32 %v1576_v43, %v988_v58 }
0x1007   :  { %v995_v61 = vrot.slane %v991_v59, 2 }
0x1008   :  { %v996_v62 = vrot.slane %v992_v60, 1 }
0x100a   :  { %v997_v63 = vsel %vm296_vm2, %v996_v62, %v995_v61 }
0x100b   :  { %998 = vrot.lane.b32.xlu1 %v997_v63, %s1685_s3 }
0x107d   :  { %v999_v0 = vpop.permute.xlu1 %998 }
0x107e   :  { %1462 = vmatmul.mubr.msk.f32.vlgmr.msra.gmra.mxu1 %vm163_vm3, %v999_v0 }
0x113e   :  { %v1068_v2 = vpop.f32.mrf.mxu1 }
0x113f   :  { %v1073_v4 = vrot.slane %v1068_v2, 7  ;;  %v1077_v6 = vadd.f32 %v1068_v2, %v1780_v18 }
0x1140   :  { %v1463_v7 = vpop.f32.mrf.mxu1 }
0x1141   :  { %v1076_v10 = vadd.f32 %v1073_v4, %v1778_v13  ;;  %1581 = vtanh.f32 %v1077_v6  ;;  %v1330_v14 = vmul.f32 -1.442695, %v1077_v6  ;;  %v1334_v4 = vld [vmem:[%s1931_s4] ss:$0 sm:$0xff] }
0x1143   :  { %1583 = vtanh.f32 %v1076_v10  ;;  %v1329_v15 = vmul.f32 -1.442695, %v1076_v10 }
0x1144   :  { %1585 = vpow2.f32 %v1330_v14 }
0x1145   :  { %1587 = vpow2.f32 %v1329_v15 }
0x114e   :  { %v1582_v11 = vpop.eup %1581 }
0x114f   :  { %1104 = vrot.lane.b32.xlu1 %v1582_v11, %s1684_s14 }
0x1150   :  { %v1584_v12 = vpop.eup %1583 }
0x1151   :  { %1102 = vrot.lane.b32.xlu0 %v1584_v12, %s1684_s14  ;;  %v1586_v16 = vpop.eup %1585 }
0x1152   :  { %v1588_v17 = vpop.eup %1587  ;;  %v1085_v19 = vadd.f32 1.0, %v1586_v16 }
0x1153   :  { %v1084_v20 = vadd.f32 1.0, %v1588_v17 }
0x1154   :  { %1589 = vrcp.f32 %v1085_v19 }
0x1155   :  { %1591 = vrcp.f32 %v1084_v20 }
0x1161   :  { %v1590_v21 = vpop.eup %1589 }
0x1162   :  { %v1592_v24 = vpop.eup %1591  ;;  %v1099_v28 = vmul.f32 %v1590_v21, %v1095_v27 }
0x1163   :  { %v1098_v32 = vmul.f32 %v1592_v24, %v1094_v29 }
0x11c1   :  { %v1105_v22 = vpop.permute.xlu1 %1104 }
0x11c2   :  { %v1109_v23 = vmul.f32 %v1590_v21, %v1105_v22 }
0x11c3   :  { %v1103_v25 = vpop.permute.xlu0 %1102 }
0x11c4   :  { %1114 = vrot.lane.b32.xlu1 %v1109_v23, %s1685_s3  ;;  %v1108_v26 = vmul.f32 %v1592_v24, %v1103_v25 }
0x11c6   :  { %1112 = vrot.lane.b32.xlu0 %v1108_v26, %s1685_s3 }
0x1236   :  { %v1115_v30 = vpop.permute.xlu1 %1114 }
0x1237   :  { %v1119_v31 = vadd.f32 %v1115_v30, %v1099_v28 }
0x1238   :  { %v1113_v33 = vpop.permute.xlu0 %1112 }
0x1239   :  { %1593 = vtanh.f32 %v1119_v31  ;;  %v1118_v34 = vadd.f32 %v1113_v33, %v1098_v32  ;;  %v1233_v58 = vrot.slane %v1119_v31, 1 }
0x123b   :  { %1595 = vtanh.f32 %v1118_v34  ;;  %v1232_v56 = vrot.slane %v1118_v34, 1 }
0x1246   :  { %v1594_v35 = vpop.eup %1593 }
0x1247   :  { %1126 = vrot.lane.b32.xlu1 %v1594_v35, %s1684_s14 }
0x1248   :  { %v1596_v3 = vpop.eup %1595 }
0x1249   :  { %1124 = vrot.lane.b32.xlu0 %v1596_v3, %s1684_s14 }
0x12b9   :  { %v1127_v36 = vpop.permute.xlu1 %1126 }
0x12ba   :  { %v1131_v8 = vmul.f32 %v1590_v21, %v1127_v36  ;;  %v1335_v21 = vld [vmem:[#allocation2] ss:$0 sm:$0xff] }
0x12bb   :  { %v1125_v37 = vpop.permute.xlu0 %1124 }
0x12bc   :  { %v1130_v5 = vmul.f32 %v1592_v24, %v1125_v37 }
0x12be   :  { %v1134_v1 = vrot.slane %v1130_v5, 1 }
0x12c0   :  { %v1135_v9 = vsel %vm296_vm2, %v1131_v8, %v1134_v1 }
0x12c1   :  { %1136 = vrot.lane.b32.xlu0 %v1135_v9, %s1685_s3 }
0x1333   :  { %v1137_v38 = vpop.permute.xlu0 %1136 }
0x1334   :  { %1473 = vmatmul.mubr.msk.f32.vlgmr.msra.gmra.mxu0 %vm163_vm3, %v1137_v38 }
0x13f4   :  { %v1206_v39 = vpop.f32.mrf.mxu0 }
0x13f5   :  { %v1211_v40 = vrot.slane %v1206_v39, 1  ;;  %v1214_v41 = vadd.f32 %v1206_v39, %v1778_v13 }
0x13f6   :  { %v1474_v42 = vpop.f32.mrf.mxu0 }
0x13f7   :  { %v1215_v43 = vadd.f32 %v1211_v40, %v1780_v18  ;;  %1597 = vtanh.f32 %v1214_v41  ;;  %v1332_v46 = vmul.f32 -1.442695, %v1214_v41 }
0x13f9   :  { %1599 = vtanh.f32 %v1215_v43  ;;  %v1333_v47 = vmul.f32 -1.442695, %v1215_v43 }
0x13fa   :  { %1601 = vpow2.f32 %v1332_v46 }
0x13fb   :  { %1603 = vpow2.f32 %v1333_v47 }
0x1404   :  { %v1598_v44 = vpop.eup %1597 }
0x1405   :  { %1240 = vrot.lane.b32.xlu0 %v1598_v44, %s1684_s14 }
0x1406   :  { %v1600_v45 = vpop.eup %1599 }
0x1407   :  { %1242 = vrot.lane.b32.xlu1 %v1600_v45, %s1684_s14  ;;  %v1602_v48 = vpop.eup %1601 }
0x1408   :  { %v1604_v49 = vpop.eup %1603  ;;  %v1222_v50 = vadd.f32 1.0, %v1602_v48 }
0x1409   :  { %v1223_v51 = vadd.f32 1.0, %v1604_v49 }
0x140a   :  { %1605 = vrcp.f32 %v1222_v50 }
0x140b   :  { %1607 = vrcp.f32 %v1223_v51 }
0x1417   :  { %v1606_v13 = vpop.eup %1605 }
0x1418   :  { %v1608_v53 = vpop.eup %1607  ;;  %v1236_v57 = vmul.f32 %v1606_v13, %v1232_v56 }
0x1419   :  { %v1237_v61 = vmul.f32 %v1608_v53, %v1233_v58 }
0x1477   :  { %v1241_v18 = vpop.permute.xlu0 %1240 }
0x1478   :  { %v1246_v52 = vmul.f32 %v1606_v13, %v1241_v18 }
0x1479   :  { %v1243_v54 = vpop.permute.xlu1 %1242 }
0x147a   :  { %1250 = vrot.lane.b32.xlu0 %v1246_v52, %s1685_s3  ;;  %v1247_v55 = vmul.f32 %v1608_v53, %v1243_v54 }
0x147c   :  { %1252 = vrot.lane.b32.xlu1 %v1247_v55, %s1685_s3 }
0x14ec   :  { %v1251_v59 = vpop.permute.xlu0 %1250 }
0x14ed   :  { %v1256_v60 = vadd.f32 %v1251_v59, %v1236_v57 }
0x14ee   :  { %v1253_v62 = vpop.permute.xlu1 %1252 }
0x14ef   :  { %1609 = vtanh.f32 %v1256_v60  ;;  %v1257_v63 = vadd.f32 %v1253_v62, %v1237_v61 }
0x14f1   :  { %1611 = vtanh.f32 %v1257_v63 }
0x14fc   :  { %v1610_v0 = vpop.eup %1609 }
0x14fd   :  { %1262 = vrot.lane.b32.xlu0 %v1610_v0, %s1684_s14 }
0x14fe   :  { %v1612_v2 = vpop.eup %1611 }
0x14ff   :  { %1264 = vrot.lane.b32.xlu1 %v1612_v2, %s1684_s14 }
0x1503   :  { %1276 = vrot.lane.b32.xlu1 %v1334_v4, %s1686_s17 }
0x156f   :  { %v1263_v7 = vpop.permute.xlu0 %1262 }
0x1570   :  { %v1268_v12 = vmul.f32 %v1606_v13, %v1263_v7 }
0x1571   :  { %v1265_v6 = vpop.permute.xlu1 %1264 }
0x1572   :  { %v1269_v10 = vmul.f32 %v1608_v53, %v1265_v6 }
0x1575   :  { %v1277_v11 = vpop.permute.xlu1 %1276 }
0x1576   :  { %v1280_v14 = vmul.f32 %v1277_v11, %v1269_v10  ;;  %v1279_v15 = vmul.f32 %v1277_v11, %v1268_v12 }
0x1578   :  { %v1283_v16 = vrot.slane %v1280_v14, 7 }
0x157a   :  { %v1284_v17 = vsel %vm296_vm2, %v1283_v16, %v1279_v15 }
0x157b   :  { %1285 = vrot.lane.b32.xlu0 %v1284_v17, %s1685_s3 }
0x15ed   :  { %v1286_v19 = vpop.permute.xlu0 %1285 }
0x15ee   :  { %v1289_v20 = vsel %vm1288_vm4, %v1286_v19, 0.0 }
0x15ef   :  { %1290 = vadd.xlane.f32.xlu1 %v1289_v20 }
0x1678   :  { %v1291_v22 = vpop.xlane.xlu1 %1290 }
0x1679   :  { %v1299_v23 = vadd.f32 %v1335_v21, %v1291_v22 }
0x167b   :  { %1301 = vst.msk [vmem:[%s1933_s6] sm:$0x3] %vm1300_vm5, %v1299_v23 }
0x167c   :  { %1306 = vsyncpa [#allocation4], 1 }
0x167d   :  { %1307 = vsyncpa [#allocation6], 1 }

</bundles_post_ra>
